<compile_context>
chip_gen: v7x
topology: tpu7x:2x2x1
jax: 0.10.0
libtpu: 0.0.40
codegen_flags: <defaults>
</compile_context>

<pallas_src>
import functools
import math

import jax
import jax.numpy as jnp
from jax.experimental import pallas as pl
from jax.experimental.pallas import tpu as pltpu


# ----------------------------------------------------------------------------
# Parameter / buffer construction (plain JAX glue, deterministic)
# ----------------------------------------------------------------------------
def make_positional_encoding_table(d_model: int, max_len: int = 1001) -> jnp.ndarray:
    """Builds the (max_len, d_model) sinusoidal table (PyTorch buffer, squeezed)."""
    position = jnp.arange(max_len, dtype=jnp.float32)[:, None]            # (L, 1)
    div_term = jnp.exp(
        jnp.arange(0, d_model, 2, dtype=jnp.float32) * (-math.log(10000.0) / d_model)
    )                                                                      # (D/2,)
    pe = jnp.zeros((max_len, d_model), dtype=jnp.float32)
    pe = pe.at[:, 0::2].set(jnp.sin(position * div_term))
    pe = pe.at[:, 1::2].set(jnp.cos(position * div_term))
    return pe


# ----------------------------------------------------------------------------
# Hardware-aware budgeting
# ----------------------------------------------------------------------------
def _round_up(v: int, m: int) -> int:
    return -(-v // m) * m


def _vmem_limit_bytes() -> int:
    """Generation-aware scoped-VMEM limit: ~3/4 of physical, capped at 100 MiB.
    v5e/v6e (128 MiB physical) -> ~96 MiB; v7x (64 MiB physical) -> 48 MiB."""
    default_cap = 64 * 1024 * 1024          # conservative fallback (v7x-sized)
    try:
        info = pltpu.get_tpu_info()
        cap = int(getattr(info, "vmem_capacity_bytes", default_cap))
    except Exception:
        cap = default_cap
    return min((cap * 3) // 4, 100 * 1024 * 1024)


def _choose_seq_tile(S: int, per_row_bytes: int, budget_bytes: int, min_steps: int) -> int:
    """Largest 8-aligned seq tile whose live buffers fit `budget_bytes`, capped so
    the grid has at least `min_steps` steps (lets v7x shard across both TCs)."""
    max_rows = max(8, (budget_bytes // max(per_row_bytes, 1)) // 8 * 8)
    tile = min(S, max_rows)
    if min_steps > 1 and S > 8:
        cap = _round_up(-(-S // min_steps), 8)
        tile = min(tile, cap)
    if tile < S:
        tile = max(8, (tile // 8) * 8)      # 8-aligned sublane slices for ragged grids
    return max(1, tile)


# ----------------------------------------------------------------------------
# Pallas kernels
# ----------------------------------------------------------------------------
def _broadcast_pe(pe, batch: int, lane_dense: bool):
    # pe: (seq_tile, D) f32.
    if lane_dense:
        # D % 128 == 0: lane-aligned tile replication -> (seq_tile, B*D).
        return jnp.tile(pe, (1, batch)) if batch > 1 else pe
    # Generic path: broadcast over the batch (sublane) axis -> (seq_tile, 1, D).
    return pe[:, None, :]


def _pe_add_kernel(x_ref, pe_ref, o_ref, *, batch: int, lane_dense: bool):
    x = x_ref[...].astype(jnp.float32)
    pe = _broadcast_pe(pe_ref[...].astype(jnp.float32), batch, lane_dense)
    o_ref[...] = (x + pe).astype(o_ref.dtype)


def _pe_add_dropout_kernel(x_ref, pe_ref, rand_ref, o_ref, *,
                           batch: int, lane_dense: bool, p_drop: float, scale: float):
    # Training-mode dropout (Bernoulli keep-mask, 1/(1-p) scaling).  Statistically
    # equivalent to torch.nn.Dropout, not bitwise identical (different RNG stream).
    # TODO(synk): on real TPUs an in-kernel pltpu.prng_random_bits draw would avoid
    # streaming the uniform array from HBM, but it has no CPU/interpret lowering.
    x = x_ref[...].astype(jnp.float32)
    pe = _broadcast_pe(pe_ref[...].astype(jnp.float32), batch, lane_dense)
    y = x + pe
    keep = rand_ref[...] >= jnp.float32(p_drop)          # P(keep) = 1 - p
    o_ref[...] = jnp.where(keep, y * jnp.float32(scale), jnp.float32(0.0)).astype(o_ref.dtype)


# ----------------------------------------------------------------------------
# Wrapper
# ----------------------------------------------------------------------------
def positional_encoding_forward(
    x: jnp.ndarray,
    pe_table: jnp.ndarray,
    *,
    dropout_p: float = 0.1,
    training: bool = False,
    rng_key=None,
    donate_x: bool = False,
) -> jnp.ndarray:
    """x: (seq, batch, d_model). Returns x + pe[:seq] (with dropout if training)."""
    S, B, D = x.shape
    assert pe_table.shape[0] >= S and pe_table.shape[1] == D

    out_dtype = jnp.result_type(x.dtype, pe_table.dtype)     # torch-style promotion
    x_item = jnp.dtype(x.dtype).itemsize
    out_item = jnp.dtype(out_dtype).itemsize

    use_dropout = bool(training) and dropout_p > 0.0
    if use_dropout:
        assert 0.0 < dropout_p < 1.0, "dropout_p must be in [0, 1)"

    lane_dense = (D % 128 == 0)
    pe_slab = pe_table[:S].astype(jnp.float32)               # (S, D)

    if lane_dense:
        # Lane-dense view (S, B*D): free reshape of a contiguous array,
        # full-width unmasked vector stores (B*D is a multiple of 128).
        x_in = x.reshape(S, B * D)
        data_shape = (S, B * D)
        block_of = lambda st: (st, B * D)
        x_map = lambda i: (i, 0)
        x_row = _round_up(B * D, 128) * x_item
        o_row = _round_up(B * D, 128) * out_item
        f_row = _round_up(B * D, 128) * 4
    else:
        # Generic 3-D block; pe broadcast over the batch (sublane) axis.
        x_in = x
        data_shape = (S, B, D)
        block_of = lambda st: (st, B, D)
        x_map = lambda i: (i, 0, 0)
        padded = _round_up(B, 8) * _round_up(D, 128)
        x_row = padded * x_item
        o_row = padded * out_item
        f_row = padded * 4
    pe_row = _round_up(D, 128) * 4

    # Live VMEM per seq row: double-buffered streams + in-kernel f32 temporaries.
    per_row = 2 * (x_row + o_row + pe_row)
    if use_dropout:
        per_row += 2 * f_row                                  # uniform stream (f32)
        per_row += 2 * f_row                                  # y + keep temporaries
    else:
        per_row += f_row                                      # f32 add temporary

    vmem_limit = _vmem_limit_bytes()
    budget = (vmem_limit * 2) // 3                            # leave headroom
    min_steps = 2 if (S * B * D * x_item) > (4 << 20) else 1  # >=2 steps on big inputs
    seq_tile = _choose_seq_tile(S, per_row, budget, min_steps)
    grid = (pl.cdiv(S, seq_tile),)

    n_elem = S * B * D
    cost = pl.CostEstimate(
        flops=n_elem * (3 if use_dropout else 1),
        transcendentals=0,
        bytes_accessed=n_elem * (x_item + out_item + (4 if use_dropout else 0)) + S * D * 4,
    )
    cparams = pltpu.CompilerParams(
        dimension_semantics=("parallel",),                    # megacore-shardable
        vmem_limit_bytes=vmem_limit,
    )
    out_shape = jax.ShapeDtypeStruct(data_shape, out_dtype)
    alias = {0: 0} if (donate_x and x.dtype == out_dtype) else {}

    x_spec = pl.BlockSpec(block_of(seq_tile), x_map)
    o_spec = pl.BlockSpec(block_of(seq_tile), x_map)
    pe_spec = pl.BlockSpec((seq_tile, D), lambda i: (i, 0))   # pipelined pe stream

    if use_dropout:
        if rng_key is None:
            rng_key = jax.random.PRNGKey(0)
        rand = jax.random.uniform(rng_key, data_shape, dtype=jnp.float32)
        rand_spec = pl.BlockSpec(block_of(seq_tile), x_map)
        kernel = functools.partial(
            _pe_add_dropout_kernel, batch=B, lane_dense=lane_dense,
            p_drop=float(dropout_p), scale=1.0 / (1.0 - float(dropout_p)))
        out = pl.pallas_call(
            kernel,
            out_shape=out_shape,
            grid_spec=pltpu.PrefetchScalarGridSpec(
                num_scalar_prefetch=0,
                grid=grid,
                in_specs=[x_spec, pe_spec, rand_spec],
                out_specs=o_spec,
            ),
            compiler_params=cparams,
            cost_estimate=cost,
            input_output_aliases=alias,
        )(x_in, pe_slab, rand)
    else:
        kernel = functools.partial(_pe_add_kernel, batch=B, lane_dense=lane_dense)
        out = pl.pallas_call(
            kernel,
            out_shape=out_shape,
            grid_spec=pltpu.PrefetchScalarGridSpec(
                num_scalar_prefetch=0,
                grid=grid,
                in_specs=[x_spec, pe_spec],
                out_specs=o_spec,
            ),
            compiler_params=cparams,
            cost_estimate=cost,
            input_output_aliases=alias,
        )(x_in, pe_slab)

    return out.reshape(S, B, D)


# ----------------------------------------------------------------------------
# Demo / self-test
# ----------------------------------------------------------------------------
if __name__ == "__main__":
    seq, batch, d_model = 16, 2, 32
    max_len = 1001

    key = jax.random.PRNGKey(0)
    x = jax.random.normal(key, (seq, batch, d_model), dtype=jnp.float32)
    pe_table = make_positional_encoding_table(d_model, max_len)

    # Pure-JAX reference (computed before any donated call).
    ref = x + pe_table[:seq][:, None, :]

    # Eval-mode forward (dropout is identity, matching nn.Dropout in eval()).
    out = jax.block_until_ready(positional_encoding_forward(x, pe_table, training=False))
    assert out.shape == (seq, batch, d_model)
    assert jnp.allclose(out, ref, atol=1e-6, rtol=1e-6), "eval-mode mismatch vs reference"

    # Exercise the input->output aliasing path on a fresh buffer.
    x_donate = x + 0.0
    out_d = jax.block_until_ready(
        positional_encoding_forward(x_donate, pe_table, training=False, donate_x=True)
    )
    assert jnp.allclose(out_d, ref, atol=1e-6, rtol=1e-6), "donated eval mismatch"

    # Lane-dense code path (D multiple of 128).
    s2, b2, d2 = 8, 2, 128
    x2 = jax.random.normal(jax.random.PRNGKey(1), (s2, b2, d2), dtype=jnp.float32)
    pe2 = make_positional_encoding_table(d2, 64)
    ref2 = x2 + pe2[:s2][:, None, :]
    out2 = jax.block_until_ready(positional_encoding_forward(x2, pe2, training=False))
    assert jnp.allclose(out2, ref2, atol=1e-6, rtol=1e-6), "lane-dense path mismatch"

    # Training-mode forward: every element is either 0 (dropped) or ref/(1-p) (kept).
    p = 0.1
    out_tr = jax.block_until_ready(
        positional_encoding_forward(
            x, pe_table, training=True, dropout_p=p, rng_key=jax.random.PRNGKey(42)
        )
    )
    scale = 1.0 / (1.0 - p)
    ok = jnp.all((out_tr == 0.0) | (jnp.abs(out_tr - ref * scale) <= 1e-4))
    assert bool(ok), "training-mode dropout output inconsistent with x + pe"

    print("KERNEL_OK")
</pallas_src>

<mosaic_0001>
module attributes {stable_mosaic.version = 11 : i64} {
  func.func @_pe_add_kernel(%arg0: i32, %arg1: memref<16x2x32xf32, #tpu.memory_space<vmem>>, %arg2: memref<16x32xf32, #tpu.memory_space<vmem>>, %arg3: memref<16x2x32xf32, #tpu.memory_space<vmem>>) attributes {dimension_semantics = [#tpu.dimension_semantics<parallel>], iteration_bounds = array<i64: 1>, scalar_prefetch = 0 : i64, scratch_operands = 0 : i64, tpu.core_type = #tpu.core_type<tc>, window_params = [{transform_indices = @transform_0, window_bounds = array<i64: 16, 2, 32>}, {transform_indices = @transform_1, window_bounds = array<i64: 16, 32>}, {transform_indices = @transform_2, window_bounds = array<i64: 16, 2, 32>}]} {
    %c0 = arith.constant 0 : index
    %c0_0 = arith.constant 0 : index
    %c0_1 = arith.constant 0 : index
    %0 = vector.load %arg1[%c0, %c0_0, %c0_1] : memref<16x2x32xf32, #tpu.memory_space<vmem>>, vector<16x2x32xf32>
    %c0_2 = arith.constant 0 : index
    %c0_3 = arith.constant 0 : index
    %1 = vector.load %arg2[%c0_2, %c0_3] : memref<16x32xf32, #tpu.memory_space<vmem>>, vector<16x32xf32>
    %2 = vector.shape_cast %1 : vector<16x32xf32> to vector<16x1x32xf32>
    %3 = vector.broadcast %2 : vector<16x1x32xf32> to vector<16x2x32xf32>
    %4 = arith.addf %0, %3 : vector<16x2x32xf32>
    %c0_4 = arith.constant 0 : index
    %c0_5 = arith.constant 0 : index
    %c0_6 = arith.constant 0 : index
    %5 = vector.load %arg3[%c0_4, %c0_5, %c0_6] : memref<16x2x32xf32, #tpu.memory_space<vmem>>, vector<16x2x32xf32>
    tpu.vector_store %arg3[%c0_4, %c0_5, %c0_6], %4 {strides = array<i32>} : memref<16x2x32xf32, #tpu.memory_space<vmem>>, vector<16x2x32xf32>,
    return
  }
  func.func @transform_0(%arg0: i32) -> (i32, i32, i32) {
    %c0_i32 = arith.constant 0 : i32
    %c0_i32_0 = arith.constant 0 : i32
    %c0_i32_1 = arith.constant 0 : i32
    return %arg0, %c0_i32, %c0_i32_0 : i32, i32, i32
  }
  func.func @transform_1(%arg0: i32) -> (i32, i32) {
    %c0_i32 = arith.constant 0 : i32
    %c0_i32_0 = arith.constant 0 : i32
    return %arg0, %c0_i32 : i32, i32
  }
  func.func @transform_2(%arg0: i32) -> (i32, i32, i32) {
    %c0_i32 = arith.constant 0 : i32
    %c0_i32_0 = arith.constant 0 : i32
    %c0_i32_1 = arith.constant 0 : i32
    return %arg0, %c0_i32, %c0_i32_0 : i32, i32, i32
  }
}

</mosaic_0001>

<bundles_post_ra>
// kernel: tpu_custom_call.1
= control target key start
LH: loop header
LB: loop body
LE: loop exit
PB: predicated region body
PF: predicated region fallthrough
CT: control target
= control target key end

     0   :  { %7 = vsyncpa [#allocation3], 0  ;;  %s482_s0 = inlined_call_operand.hbm [shape: f32[16,2,32], index: 0, kind: input, shape index: {}]   ;;  %s483_s1 = inlined_call_operand.hbm [shape: f32[16,32], index: 1, kind: input, shape index: {}]   ;;  %s484_s2 = inlined_call_operand.hbm [shape: f32[16,2,32], index: 2, kind: output, shape index: {}]  }
   0x1   :  { %8 = vsyncpa [#allocation6], 0 }
   0x2   :  { %9 = vsyncpa [#allocation4], 0  ;;  %s369_s9 = smov [#allocation2]   ;;  %s297_s13 = scalar_lea.hbm %s482_s0, 512 }
   0x3   :  { %s15_s10 = sshll.u32 %s369_s9, 4  ;;  %p298_p0 = scmp.ne.s32.totalorder %s482_s0, %s297_s13  ;;  %s16_s10 = int_to_ptr.vmem [resolvable:$true] %s15_s10 }
   0x4   :  { %p301_p1 = scmp.lt.u32.totalorder %s297_s13, %s482_s0 }
   0x6   :  { %p303_p2 = pnand %p301_p1, %p298_p0 }
   0x8   :  { %306 = shalt.err (!%p303_p2)
}
   0x9   :  { %s307_s18 = scalar_lea.vmem %s16_s10, 512  ;;  %p312_p4 = scmp.lt.s32.totalorder %s16_s10, %s16_s10 }
   0xa   :  { %p308_p3 = scmp.ne.s32.totalorder %s16_s10, %s307_s18  ;;  %p313_p5 = scmp.lt.s32.totalorder %s307_s18, %s307_s18 }
   0xc   :  { %p314_p6 = por %p313_p5, %p312_p4 }
   0xe   :  { %p315_p7 = pnand %p314_p6, %p308_p3 }
  0x10   :  { %318 = shalt.err (!%p315_p7)
}
  0x11   :  { %s370_s19 = smov 32   ;;  %s371_s20 = smov 2  }
  0x12   :  { %21 = dma.hbm_to_vmem [thread:$0]  %s482_s0, 512, %s16_s10, [#allocation3], %s370_s19, %s370_s19, %s371_s20  }
  0x13   :  { %s372_s23 = smov [#allocation5]   ;;  %s319_s27 = scalar_lea.hbm %s483_s1, 256 }
  0x14   :  { %s27_s24 = sshll.u32 %s372_s23, 4  ;;  %p320_p8 = scmp.ne.s32.totalorder %s483_s1, %s319_s27  ;;  %s28_s24 = int_to_ptr.vmem [resolvable:$true] %s27_s24 }
  0x15   :  { %p323_p9 = scmp.lt.u32.totalorder %s319_s27, %s483_s1 }
  0x17   :  { %p325_p10 = pnand %p323_p9, %p320_p8 }
  0x19   :  { %328 = shalt.err (!%p325_p10)
}
  0x1a   :  { %s329_s4 = scalar_lea.vmem %s28_s24, 256  ;;  %p334_p12 = scmp.lt.s32.totalorder %s28_s24, %s28_s24 }
  0x1b   :  { %p330_p11 = scmp.ne.s32.totalorder %s28_s24, %s329_s4  ;;  %p335_p13 = scmp.lt.s32.totalorder %s329_s4, %s329_s4 }
  0x1d   :  { %p336_p0 = por %p335_p13, %p334_p12 }
  0x1f   :  { %p337_p1 = pnand %p336_p0, %p330_p11 }
  0x21   :  { %340 = shalt.err (!%p337_p1)
}
  0x22   :  { %s373_s0 = smov 128   ;;  %s374_s5 = smov 8  }
  0x23   :  { %33 = dma.hbm_to_vmem [thread:$0]  %s483_s1, 256, %s28_s24, [#allocation6], %s373_s0, %s373_s0, %s374_s5  }
  0x24   :  { %363 = dma.done.wait [#allocation3], 512  }
  0x25   :  { %364 = vsyncadd [#allocation3], 4294966784 }
  0x26   :  { %365 = dma.done.wait [#allocation6], 256  }
  0x27   :  { %366 = vsyncadd [#allocation6], 4294967040  ;;  %v64_v0 = vlaneseq  ;;  %v375_v1 = vmov 1966171168   ;;  %v56_v6 = vld [vmem:[#allocation5] sm:$0xff]  ;;  %v57_v13 = vld [vmem:[#allocation5 + $0x8] sm:$0xff] }
  0x28   :  { %v62_v2 = vunpack.c.l.s4 %v375_v1  ;;  %v60_v9 = vcombine.high %v56_v6, %v56_v6  ;;  %v40_v14 = vld [vmem:[#allocation2] sm:$0x3]  ;;  %vm254_vm0 = vcmask 254976   ;;  %v109_v16 = vcombine.high %v57_v13, %v57_v13  ;;  %v41_v21 = vld [vmem:[#allocation2 + $0x2] sm:$0x3]  ;;  %s376_s1 = smov [#allocation7]  }
  0x29   :  { %v65_v3 = vshrl.u32 %v64_v0, 7  ;;  %v42_v22 = vld [vmem:[#allocation2 + $0x4] sm:$0x3]  ;;  %v44_v31 = vld [vmem:[#allocation2 + $0x8] sm:$0x3]  ;;  %s276_s8 = sshll.u32 %s376_s1, 4  ;;  %s277_s8 = int_to_ptr.vmem [resolvable:$true] %s276_s8 }
  0x2a   :  { %v63_v4 = vunpack.c.0.s8 %v62_v2  ;;  %v43_v32 = vld [vmem:[#allocation2 + $0x6] sm:$0x3]  ;;  %v48_v36 = vld [vmem:[#allocation2 + $0x10] sm:$0x3]  ;;  %v45_v41 = vld [vmem:[#allocation2 + $0xa] sm:$0x3]  ;;  %p346_p3 = scmp.lt.s32.totalorder %s277_s8, %s277_s8 }
  0x2b   :  { %v422_v8 = vsub.s32 0, %v65_v3  ;;  %v46_v42 = vld [vmem:[#allocation2 + $0xc] sm:$0x3]  ;;  %v49_v48 = vld [vmem:[#allocation2 + $0x12] sm:$0x3]  ;;  %s341_s9 = scalar_lea.vmem %s277_s8, 512 }
  0x2c   :  { %v419_v5 = vsub.s32 %v63_v4, %v65_v3  ;;  %v47_v50 = vld [vmem:[#allocation2 + $0xe] sm:$0x3]  ;;  %v50_v57 = vld [vmem:[#allocation2 + $0x14] sm:$0x3]  ;;  %v51_v61 = vld [vmem:[#allocation2 + $0x16] sm:$0x3]  ;;  %p342_p2 = scmp.ne.s32.totalorder %s277_s8, %s341_s9  ;;  %p347_p4 = scmp.lt.s32.totalorder %s341_s9, %s341_s9 }
  0x2d   :  { %v52_v2 = vld [vmem:[#allocation2 + $0x18] sm:$0x3] }
  0x2e   :  { %v67_v7 = vrot.slane %v56_v6, %v419_v5  ;;  %v74_v12 = vrot.slane %v60_v9, %v419_v5  ;;  %v116_v15 = vrot.slane %v57_v13, %v419_v5  ;;  %v123_v26 = vrot.slane %v109_v16, %v419_v5  ;;  %v55_v16 = vld [vmem:[#allocation2 + $0x1e] sm:$0x3]  ;;  %p348_p5 = por %p347_p4, %p346_p3 }
  0x30   :  { %v83_v10 = vrot.slane %v67_v7, %v419_v5  ;;  %v75_v11 = vcombine.high %v67_v7, %v67_v7  ;;  %v90_v20 = vrot.slane %v74_v12, %v419_v5  ;;  %v76_v23 = vcombine.high %v74_v12, %v74_v12  ;;  %p349_p6 = pnand %p348_p5, %p342_p2 }
  0x31   :  { %v132_v24 = vrot.slane %v116_v15, %v419_v5  ;;  %v124_v25 = vcombine.high %v116_v15, %v116_v15  ;;  %v139_v62 = vrot.slane %v123_v26, %v419_v5  ;;  %v125_v63 = vcombine.high %v123_v26, %v123_v26 }
  0x32   :  { %v161_v17 = vrot.slane %v83_v10, %v422_v8  ;;  %v97_v18 = vrot.slane %v75_v11, %v419_v5  ;;  %v105_v19 = vcombine.high %v83_v10, %v83_v10  ;;  %v177_v33 = vrot.slane %v90_v20, %v422_v8  ;;  %v53_v10 = vld [vmem:[#allocation2 + $0x1a] sm:$0x3]  ;;  %v54_v11 = vld [vmem:[#allocation2 + $0x1c] sm:$0x3] }
  0x33   :  { %v104_v34 = vrot.slane %v76_v23, %v419_v5  ;;  %v106_v35 = vcombine.high %v90_v20, %v90_v20  ;;  %v193_v37 = vrot.slane %v132_v24, %v422_v8  ;;  %v146_v43 = vrot.slane %v124_v25, %v419_v5 }
  0x34   :  { %v238_v27 = vadd.f32 %v161_v17, %v40_v14  ;;  %v165_v28 = vrot.slane %v97_v18, %v422_v8  ;;  %v169_v29 = vrot.slane %v105_v19, %v422_v8  ;;  %v107_v30 = vcombine.high %v97_v18, %v97_v18 }
  0x35   :  { %v242_v44 = vadd.f32 %v177_v33, %v44_v31  ;;  %v181_v45 = vrot.slane %v104_v34, %v422_v8  ;;  %v185_v46 = vrot.slane %v106_v35, %v422_v8  ;;  %v108_v47 = vcombine.high %v104_v34, %v104_v34 }
  0x36   :  { %255 = vst.msk [vmem:[#allocation7] sm:$0x3] %vm254_vm0, %v238_v27  ;;  %v239_v38 = vadd.f32 %v165_v28, %v41_v21  ;;  %v240_v39 = vadd.f32 %v169_v29, %v42_v22  ;;  %v173_v40 = vrot.slane %v107_v30, %v422_v8  ;;  %v246_v51 = vadd.f32 %v193_v37, %v48_v36 }
  0x37   :  { %v197_v52 = vrot.slane %v146_v43, %v422_v8  ;;  %v154_v53 = vcombine.high %v132_v24, %v132_v24  ;;  %259 = vst.msk [vmem:[#allocation7 + $0x8] sm:$0x3] %vm254_vm0, %v242_v44  ;;  %v243_v54 = vadd.f32 %v181_v45, %v45_v41  ;;  %v244_v55 = vadd.f32 %v185_v46, %v46_v42 }
  0x38   :  { %256 = vst.msk [vmem:[#allocation7 + $0x2] sm:$0x3] %vm254_vm0, %v239_v38  ;;  %257 = vst.msk [vmem:[#allocation7 + $0x4] sm:$0x3] %vm254_vm0, %v240_v39  ;;  %v241_v49 = vadd.f32 %v173_v40, %v43_v32  ;;  %v189_v56 = vrot.slane %v108_v47, %v422_v8  ;;  %v156_v58 = vcombine.high %v146_v43, %v146_v43 }
  0x39   :  { %263 = vst.msk [vmem:[#allocation7 + $0x10] sm:$0x3] %vm254_vm0, %v246_v51  ;;  %v247_v59 = vadd.f32 %v197_v52, %v49_v48  ;;  %v201_v60 = vrot.slane %v154_v53, %v422_v8  ;;  %260 = vst.msk [vmem:[#allocation7 + $0xa] sm:$0x3] %vm254_vm0, %v243_v54  ;;  %v209_v4 = vrot.slane %v139_v62, %v422_v8 }
  0x3a   :  { %258 = vst.msk [vmem:[#allocation7 + $0x6] sm:$0x3] %vm254_vm0, %v241_v49  ;;  %261 = vst.msk [vmem:[#allocation7 + $0xc] sm:$0x3] %vm254_vm0, %v244_v55  ;;  %v245_v0 = vadd.f32 %v189_v56, %v47_v50  ;;  %v205_v1 = vrot.slane %v156_v58, %v422_v8  ;;  %v153_v6 = vrot.slane %v125_v63, %v419_v5 }
  0x3b   :  { %264 = vst.msk [vmem:[#allocation7 + $0x12] sm:$0x3] %vm254_vm0, %v247_v59  ;;  %v248_v3 = vadd.f32 %v201_v60, %v50_v57  ;;  %v155_v7 = vcombine.high %v139_v62, %v139_v62  ;;  %v250_v12 = vadd.f32 %v209_v4, %v52_v2 }
  0x3c   :  { %262 = vst.msk [vmem:[#allocation7 + $0xe] sm:$0x3] %vm254_vm0, %v245_v0  ;;  %v249_v9 = vadd.f32 %v205_v1, %v51_v61  ;;  %v213_v13 = vrot.slane %v153_v6, %v422_v8  ;;  %v157_v15 = vcombine.high %v153_v6, %v153_v6 }
  0x3d   :  { %265 = vst.msk [vmem:[#allocation7 + $0x14] sm:$0x3] %vm254_vm0, %v248_v3  ;;  %v217_v14 = vrot.slane %v155_v7, %v422_v8  ;;  %267 = vst.msk [vmem:[#allocation7 + $0x18] sm:$0x3] %vm254_vm0, %v250_v12 }
  0x3e   :  { %266 = vst.msk [vmem:[#allocation7 + $0x16] sm:$0x3] %vm254_vm0, %v249_v9  ;;  %v251_v5 = vadd.f32 %v213_v13, %v53_v10  ;;  %v221_v18 = vrot.slane %v157_v15, %v422_v8 }
  0x3f   :  { %v252_v17 = vadd.f32 %v217_v14, %v54_v11 }
  0x40   :  { %268 = vst.msk [vmem:[#allocation7 + $0x1a] sm:$0x3] %vm254_vm0, %v251_v5  ;;  %v253_v19 = vadd.f32 %v221_v18, %v55_v16 }
  0x41   :  { %269 = vst.msk [vmem:[#allocation7 + $0x1c] sm:$0x3] %vm254_vm0, %v252_v17 }
  0x42   :  { %270 = vst.msk [vmem:[#allocation7 + $0x1e] sm:$0x3] %vm254_vm0, %v253_v19 }
  0x43   :  { %352 = shalt.err (!%p349_p6)
}
  0x44   :  { %s353_s12 = scalar_lea.hbm %s484_s2, 512 }
  0x45   :  { %p354_p7 = scmp.ne.s32.totalorder %s484_s2, %s353_s12  ;;  %p357_p8 = scmp.lt.u32.totalorder %s353_s12, %s484_s2 }
  0x47   :  { %p359_p9 = pnand %p357_p8, %p354_p7 }
  0x49   :  { %362 = shalt.err (!%p359_p9)
}
  0x4a   :  { %282 = dma.vmem_to_hbm [thread:$0]  %s277_s8, 512, %s484_s2, [#allocation4], %s370_s19, %s370_s19, %s371_s20  }
  0x4b   :  { %367 = dma.done.wait [#allocation4], 512  }
  0x4c   :  { %368 = vsyncadd [#allocation4], 4294966784 }
  0x4d   :  { %286 = vsyncpa [#allocation3], 1 }
  0x4e   :  { %287 = vsyncpa [#allocation6], 1 }
  0x4f   :  { %288 = vsyncpa [#allocation4], 1 }

</bundles_post_ra>
